<compile_context>
chip_gen: v7x
topology: tpu7x:2x2x1
jax: 0.10.0
libtpu: 0.0.40
codegen_flags: <defaults>
</compile_context>

<pallas_src>
import jax
import jax.numpy as jnp
from jax.experimental import pallas as pl
from jax.experimental.pallas import tpu as pltpu


def _outconv_kernel(x_ref, w_ref, b_ref, o_ref):
    # x_ref: (Cin, TM) bf16   w_ref: (Cout, Cin) bf16
    # b_ref: (Cout, 1) f32    o_ref: (Cout, TM) bf16
    acc = jnp.dot(w_ref[...], x_ref[...], preferred_element_type=jnp.float32)
    o_ref[...] = (acc + b_ref[...]).astype(o_ref.dtype)


def outconv_pallas(x_nchw, weight, bias, *, tm=None, act_dtype=jnp.bfloat16):
    """1x1 conv head.

    x_nchw: (N, Cin, H, W); weight: (Cout, Cin, 1, 1); bias: (Cout,).
    Returns (N, Cout, H, W) in `act_dtype` (bf16 streaming, f32 accumulate).
    """
    N, Cin, H, W = x_nchw.shape
    Cout = weight.shape[0]
    M = H * W
    act_itemsize = jnp.dtype(act_dtype).itemsize

    # --- M-tile selection -------------------------------------------------
    # Target ~4 MiB of HBM streaming traffic per grid step (x tile + out tile).
    if tm is None:
        target_bytes = 4 * 1024 * 1024
        tm = max(128, target_bytes // ((Cin + Cout) * act_itemsize))
    tm = min(tm, M)
    if M >= 128:
        tm = max(128, (tm // 128) * 128)  # lane-dense multiple of 128

    # Keep at least ~4 grid points so both v7x TensorCores get work.
    min_points = 4
    if N < min_points and M > 128:
        want_tiles = -(-min_points // N)            # ceil(min_points / N)
        tm_cap = max(128, (M // want_tiles // 128) * 128)
        tm = min(tm, tm_cap)

    m_tiles = pl.cdiv(M, tm)  # ragged last tile: Pallas masks the store

    # --- operands ----------------------------------------------------------
    # NCHW is already (N, Cin, H*W)-contiguous: pure reshape, no transpose.
    x3 = x_nchw.reshape(N, Cin, M).astype(act_dtype)
    w_mat = weight.reshape(Cout, Cin).astype(act_dtype)
    b_col = bias.astype(jnp.float32).reshape(Cout, 1)

    cost = pl.CostEstimate(
        flops=2 * N * M * Cin * Cout,
        transcendentals=0,
        bytes_accessed=(N * Cin * M + N * Cout * M) * act_itemsize
        + Cout * Cin * act_itemsize
        + Cout * 4,
    )

    out3 = pl.pallas_call(
        _outconv_kernel,
        out_shape=jax.ShapeDtypeStruct((N, Cout, M), act_dtype),
        grid_spec=pl.GridSpec(
            grid=(N, m_tiles),
            in_specs=[
                # Leading None squeezes the size-1 batch dim out of the kernel ref.
                pl.BlockSpec((None, Cin, tm), lambda n, m: (n, 0, m)),
                pl.BlockSpec((Cout, Cin), lambda n, m: (0, 0)),
                pl.BlockSpec((Cout, 1), lambda n, m: (0, 0)),
            ],
            out_specs=pl.BlockSpec((None, Cout, tm), lambda n, m: (n, 0, m)),
        ),
        compiler_params=pltpu.CompilerParams(
            dimension_semantics=("parallel", "parallel"),
            vmem_limit_bytes=32 * 1024 * 1024,
        ),
        cost_estimate=cost,
    )(x3, w_mat, b_col)

    # (N, Cout, M) -> (N, Cout, H, W): pure reshape, no transpose.
    return out3.reshape(N, Cout, H, W)


if __name__ == "__main__":
    key = jax.random.PRNGKey(0)
    k_x, k_w, k_b = jax.random.split(key, 3)

    N, Cin, H, W = 2, 4, 16, 16
    Cout = 8

    x = jax.random.normal(k_x, (N, Cin, H, W), dtype=jnp.float32)
    # Deterministic init matching Conv2d parameter shapes (kernel_size=1).
    bound = 1.0 / (Cin ** 0.5)
    weight = jax.random.uniform(k_w, (Cout, Cin, 1, 1), jnp.float32, -bound, bound)
    bias = jax.random.uniform(k_b, (Cout,), jnp.float32, -bound, bound)

    out = jax.block_until_ready(outconv_pallas(x, weight, bias))

    # Reference: plain-JAX f32 1x1 conv (einsum over channels).  The kernel
    # streams activations in bf16 (f32 accumulate), so compare with a bf16-
    # appropriate tolerance.
    ref = jnp.einsum("nchw,oc->nohw", x, weight.reshape(Cout, Cin)) \
        + bias.reshape(1, Cout, 1, 1)

    assert out.shape == (N, Cout, H, W)
    assert jnp.allclose(out.astype(jnp.float32), ref, atol=1e-1, rtol=5e-2)
    print("KERNEL_OK")
</pallas_src>

<mosaic_0001>
module attributes {stable_mosaic.version = 11 : i64} {
  func.func @_outconv_kernel(%arg0: i32, %arg1: i32, %arg2: memref<1x4x128xbf16, #tpu.memory_space<vmem>>, %arg3: memref<8x4xbf16, #tpu.memory_space<vmem>>, %arg4: memref<8x1xf32, #tpu.memory_space<vmem>>, %arg5: memref<1x8x128xbf16, #tpu.memory_space<vmem>>) attributes {dimension_semantics = [#tpu.dimension_semantics<parallel>, #tpu.dimension_semantics<parallel>], iteration_bounds = array<i64: 2, 2>, scalar_prefetch = 0 : i64, scratch_operands = 0 : i64, tpu.core_type = #tpu.core_type<tc>, window_params = [{transform_indices = @transform_0, window_bounds = array<i64: 1, 4, 128>}, {pipeline_mode = #tpu.pipeline_mode<synchronous>, transform_indices = @transform_1, window_bounds = array<i64: 8, 4>}, {pipeline_mode = #tpu.pipeline_mode<synchronous>, transform_indices = @transform_2, window_bounds = array<i64: 8, 1>}, {transform_indices = @transform_3, window_bounds = array<i64: 1, 8, 128>}]} {
    %c0 = arith.constant 0 : index
    %c0_0 = arith.constant 0 : index
    %0 = vector.load %arg3[%c0, %c0_0] : memref<8x4xbf16, #tpu.memory_space<vmem>>, vector<8x4xbf16>
    %c0_1 = arith.constant 0 : index
    %c0_2 = arith.constant 0 : index
    %c0_3 = arith.constant 0 : index
    %1 = vector.load %arg2[%c0_1, %c0_2, %c0_3] : memref<1x4x128xbf16, #tpu.memory_space<vmem>>, vector<1x4x128xbf16>
    %2 = vector.shape_cast %1 : vector<1x4x128xbf16> to vector<4x128xbf16>
    %cst = arith.constant dense<0.000000e+00> : vector<8x128xf32>
    %3 = tpu.matmul %0, %2, %cst {dimension_numbers = #tpu.dot_dimension_numbers<[1], [0], [0], [1], [0, 0, 1, 1], [], []>} : vector<8x4xbf16>, vector<4x128xbf16>, vector<8x128xf32> -> vector<8x128xf32>
    %c0_4 = arith.constant 0 : index
    %c0_5 = arith.constant 0 : index
    %4 = vector.load %arg4[%c0_4, %c0_5] : memref<8x1xf32, #tpu.memory_space<vmem>>, vector<8x1xf32>
    %5 = vector.broadcast %4 : vector<8x1xf32> to vector<8x128xf32>
    %6 = arith.addf %3, %5 : vector<8x128xf32>
    %7 = arith.truncf %6 : vector<8x128xf32> to vector<8x128xbf16>
    %c0_6 = arith.constant 0 : index
    %c0_7 = arith.constant 0 : index
    %c0_8 = arith.constant 0 : index
    %8 = vector.load %arg5[%c0_6, %c0_7, %c0_8] : memref<1x8x128xbf16, #tpu.memory_space<vmem>>, vector<1x8x128xbf16>
    %9 = vector.shape_cast %8 : vector<1x8x128xbf16> to vector<8x128xbf16>
    %10 = vector.shape_cast %7 : vector<8x128xbf16> to vector<1x8x128xbf16>
    tpu.vector_store %arg5[%c0_6, %c0_7, %c0_8], %10 {strides = array<i32>} : memref<1x8x128xbf16, #tpu.memory_space<vmem>>, vector<1x8x128xbf16>,
    return
  }
  func.func @transform_0(%arg0: i32, %arg1: i32) -> (i32, i32, i32) {
    %c0_i32 = arith.constant 0 : i32
    %c0_i32_0 = arith.constant 0 : i32
    return %arg0, %c0_i32, %arg1 : i32, i32, i32
  }
  func.func @transform_1(%arg0: i32, %arg1: i32) -> (i32, i32) {
    %c0_i32 = arith.constant 0 : i32
    %c0_i32_0 = arith.constant 0 : i32
    %c0_i32_1 = arith.constant 0 : i32
    return %c0_i32, %c0_i32_0 : i32, i32
  }
  func.func @transform_2(%arg0: i32, %arg1: i32) -> (i32, i32) {
    %c0_i32 = arith.constant 0 : i32
    %c0_i32_0 = arith.constant 0 : i32
    %c0_i32_1 = arith.constant 0 : i32
    return %c0_i32, %c0_i32_0 : i32, i32
  }
  func.func @transform_3(%arg0: i32, %arg1: i32) -> (i32, i32, i32) {
    %c0_i32 = arith.constant 0 : i32
    %c0_i32_0 = arith.constant 0 : i32
    return %arg0, %c0_i32, %arg1 : i32, i32, i32
  }
}

</mosaic_0001>

<bundles_post_ra>
// kernel: tpu_custom_call.1
= control target key start
LH: loop header
LB: loop body
LE: loop exit
PB: predicated region body
PF: predicated region fallthrough
CT: control target
= control target key end

     0   :  { %8 = vsyncpa [#allocation3], 0  ;;  %s707_s0 = inlined_call_operand.vmem [shape: bf16[2,4,256], index: 0, kind: input, shape index: {}]   ;;  %s708_s1 = inlined_call_operand.vmem [shape: bf16[8,4], index: 1, kind: input, shape index: {}]   ;;  %s709_s2 = inlined_call_operand.vmem [shape: f32[8,1], index: 2, kind: input, shape index: {}]   ;;  %s710_s3 = inlined_call_operand.hbm [shape: bf16[2,8,256], index: 3, kind: output, shape index: {}]  }
   0x1   :  { %10 = vsyncpa [#allocation3 + $0x1], 0  ;;  %s564_s12 = smov 0   ;;  %s566_s13 = smov 0  }
   0x2   :  { %s568_s14 = smov 0   ;;  %s570_s15 = smov 0  }
   0x3   :  { %s572_s16 = smov 0   ;;  %s574_s17 = smov 0  }
   0x4   :  { %s576_s18 = smov 0   ;;  %s578_s19 = smov 0  }
   0x5 LB: > { %s347_s20 = sadd.s32 4294967295, %s538_s19   ;;  %s348_s21 = sadd.s32 4294967294, %s538_s19   ;;  %s538_s19 = sphi %s578_s19, %s16_s19   ;;  %s534_s18 = sphi %s576_s18, %s719_s18   ;;  %s530_s17 = sphi %s574_s17, %s718_s17   ;;  %s526_s16 = sphi %s572_s16, %s717_s16   ;;  %s522_s15 = sphi %s570_s15, %s716_s15   ;;  %s518_s14 = sphi %s568_s14, %s715_s14   ;;  %s514_s13 = sphi %s566_s13, %s714_s13   ;;  %s510_s12 = sphi %s564_s12, %s713_s12  }
   0x6   : > { %s25_s22 = sadd.s32 1, %s530_s17  ;;  %s28_s23 = sadd.s32 1, %s534_s18 }
   0x7   : > { %p26_p0 = scmp.ge.s32.totalorder %s25_s22, 2  ;;  %p117_p1 = scmp.ne.s32.totalorder %s518_s14, %s514_s13 }
   0x8   : > { %p118_p2 = scmp.eq.s32.totalorder %s347_s20, 3  ;;  %p123_p5 = scmp.ne.s32.totalorder %s514_s13, %s510_s12 }
   0x9   : > { %s721_s22 = smov (%p26_p0, %s25_s22), 0  ;;  %s723_s23 = smov (!%p26_p0, %s28_s23), %s534_s18 }
   0xa   : > { %s103_s24 = ssub.s32 %s530_s17, %s721_s22  ;;  %p615_p3 = por %p118_p2, %p117_p1 }
   0xb   : > { %p30_p4 = scmp.ge.s32.totalorder %s723_s23, 2  ;;  %p124_p6 = scmp.eq.s32.totalorder %s348_s21, 3 }
   0xc   : > { %p351_p7 = scmp.ge.s32.totalorder %s538_s19, 1  ;;  %p159_p9 = scmp.lt.s32.totalorder %s538_s19, 5 }
   0xd   : > { %s725_s23 = smov (%p30_p4, %s723_s23), 0  ;;  %p624_p8 = por %p124_p6, %p123_p5 }
   0xe   : > { %s102_s27 = ssub.s32 %s534_s18, %s725_s23  ;;  %s107_s28 = sadd.s32 1, %s518_s14 }
   0xf   : > { %s104_s29 = sor.u32 %s103_s24, %s102_s27  ;;  %p160_p10 = pnand %p351_p7, %p159_p9 }
  0x10   : > { %p105_p11 = scmp.eq.s32.totalorder %s104_s29, 0  ;;  %p186_p12 = scmp.lt.s32.totalorder (!%p160_p10), %s526_s16, 1  ;;  %v540_v0 = vmov (!%p160_p10), 0.0   ;;  %vm541_vm0 = vmmov (!%p160_p10), 0   ;;  %v197_v1 = vld [vmem:[%s709_s2] sm:$0xff] (!%p160_p10)  ;;  %v542_v2 = vmov (!%p160_p10), 0  }
  0x11   : > { %163 = sbr.rel (%p160_p10) target bundleno = 265 (0x109), region = 32  ;;  %p188_p13 = scmp.lt.s32.totalorder (!%p160_p10), %s522_s15, 1  ;;  %363 = vmatprep.subr.bf16.mxu0 (!%p160_p10), %v540_v0  ;;  %365 = vmatprep.mubr.msk.bf16.mxu0 (!%p160_p10), %vm541_vm0, %v540_v0  ;;  %vm207_vm1 = vcmask (!%p160_p10), 1041408   ;;  %v195_v5 = vld [vmem:[%s708_s1] sm:$0xf] (!%p160_p10)  ;;  %vm203_vm2 = vcmask (!%p160_p10), 31744  }
  0x12   : > { %s633_s30 = scalar_select %p105_p11, %s518_s14, %s107_s28  }
  0x13   : > { %443 = vset.pattern.permute.xlu0 (!%p160_p10), %v542_v2  ;;  %s183_s28 = sand.u32 (!%p160_p10), 1, %s514_s13   ;;  %s357_s4 = sshll.u32 (!%p160_p10), %s526_s16, 1 }
  0x14   : > { %200 = vperm.xlu0 (!%p160_p10), %443, %v197_v1   ;;  %s352_s29 = sshll.u32 (!%p160_p10), %s183_s28, 2  ;;  %s265_s5 = sadd.s32 (!%p160_p10), %s522_s15, %s357_s4 }
  0x15   : > { %s543_s20 = smov (!%p160_p10), [#allocation2]  }
  0x18   : > { %s187_s6 = scalar_select %p186_p12, %s526_s16, 1 }
  0x19   : > { %s189_s7 = scalar_select %p188_p13, %s522_s15, 1 }
  0x1a   : > { %s353_s8 = sshll.u32 %s187_s6, 1  ;;  %s358_s6 = sshll.u32 %s265_s5, 6 }
  0x1b   : > { %s191_s9 = sadd.s32 %s353_s8, %s189_s7  ;;  %s185_s7 = scalar_lea.vmem [#allocation2], %s352_s29 }
  0x1c   : > { %s354_s10 = sshll.u32 %s191_s9, 1  ;;  %s269_s8 = sshll.u32 %s185_s7, 4  ;;  %s656_s8 = int_to_ptr.vmem [resolvable:$true] %s269_s8 }
  0x1d   : > { %s193_s21 = scalar_lea.vmem %s707_s0, %s354_s10  ;;  %s654_s11 = scalar_lea.hbm %s710_s3, %s358_s6 }
  0x1e   : > { %v196_v3 = vld [vmem:[%s193_s21] sm:$0x3]  ;;  %s254_s15 = scalar_lea.sflag [#allocation3], %s183_s28  ;;  %s444_s16 = scalar_lea.vmem %s656_s8, 64 }
  0x1f   : > { %v209_v4 = vsel %vm207_vm1, %v196_v3, 0  ;;  %p445_p0 = scmp.ne.s32.totalorder %s656_s8, %s444_s16  ;;  %s448_s21 = sshll.u32 %s543_s20, 4  ;;  %s449_s21 = int_to_ptr.vmem [resolvable:$false] %s448_s21 }
  0x20   : > { %364 = vmatpush3.bf16.msra.mxu0 %v209_v4  ;;  %s450_s24 = scalar_lea.vmem %s449_s21, 128  ;;  %p451_p4 = scmp.lt.s32.totalorder %s656_s8, %s449_s21 }
  0x21   : > { %p446_p1 = pnand %p445_p0, %p615_p3  ;;  %p452_p5 = scmp.lt.s32.totalorder %s450_s24, %s444_s16 }
  0x23   : > { %366 = vmatmul.mubr.msk.bf16.vlgmr.msra.gmra.mrb[0].mxu0 %vm203_vm2, %v195_v5  ;;  %p447_p2 = pneg %p446_p1  ;;  %p453_p6 = por %p452_p5, %p451_p4 }
  0x25   : > { %p454_p7 = pnand %p453_p6, %p447_p2 }
  0x93   : > { %v201_v6 = vpop.permute.xlu0 %200 }
  0xf6   : > { %v245_v7 = vpop.f32.mrb[0].mxu0 }
  0xf7   : > { %v246_v8 = vadd.f32 %v245_v7, %v201_v6  ;;  %v367_v9 = vpop.f32.mrb[1].mxu0 }
  0xf8   : > { %v248_v10 = vpop.f32.mrb[2].mxu0 }
  0xf9   : > { %v251_v11 = vpack.c.bf16 %v246_v8, %v246_v8  ;;  %v368_v12 = vpop.f32.mrb[3].mxu0 }
  0xfb   : > { %252 = vst [vmem:[%s185_s7] sm:$0xf] %v251_v11 }
  0xfc   : > { %457 = shalt.err (!%p454_p7)
}
  0xfd   : > { %s458_s27 = scalar_lea.hbm %s654_s11, 64  ;;  %s462_s4 = scalar_lea.hbm %s710_s3, 256 }
  0xfe   : > { %p459_p9 = scmp.ne.s32.totalorder %s654_s11, %s458_s27  ;;  %p463_p12 = scmp.lt.u32.totalorder %s654_s11, %s710_s3 }
  0xff   : > { %p464_p13 = scmp.lt.u32.totalorder %s462_s4, %s458_s27  ;;  %p466_p1 = scmp.lt.u32.totalorder %s458_s27, %s654_s11 }
 0x100   : > { %p460_p10 = pnand %p459_p9, %p615_p3 }
 0x101   : > { %p465_p0 = por %p464_p13, %p463_p12 }
 0x102   : > { %p461_p11 = pneg %p460_p10 }
 0x103   : > { %p467_p2 = por %p466_p1, %p465_p0 }
 0x105   : > { %p468_p4 = pnand %p467_p2, %p461_p11 }
 0x107   : > { %471 = shalt.err (!%p468_p4)
}
 0x108   : > { %369 = dma.vmem_to_hbm [thread:$0]  (%p615_p3), %s656_s8, 64, %s654_s11, %s254_s15  }
 0x109 PF: > { %p375_p5 = scmp.ge.s32.totalorder %s538_s19, 2  ;;  %s281_s7 = sand.u32 1, %s510_s12  }
 0x10a   : > { %s282_s9 = scalar_lea.sflag [#allocation3], %s281_s7 }
 0x10b   : > { %p372_p6 = pnand %p375_p5, %p624_p8 }
 0x10d   : > { %505 = dma.done.wait (!%p372_p6), %s282_s9, 64  }
 0x10e   : > { %507 = vsyncadd (!%p372_p6), %s282_s9, 4294967232  ;;  %s16_s19 = sadd.s32 1, %s538_s19   ;;  %s713_s12 = smov %s514_s13 }
 0x10f   : > { %p13_p7 = scmp.ge.s32.totalorder %s16_s19, 6   ;;  %s714_s13 = smov %s518_s14 }
 0x110   : > { %s715_s14 = smov %s633_s30  ;;  %s716_s15 = smov %s530_s17 }
 0x111   : > { %s717_s16 = smov %s534_s18  ;;  %s718_s17 = smov %s721_s22 }
 0x112   : > { %s719_s18 = smov %s725_s23  ;;  %15 = sbr.rel (!%p13_p7) target bundleno = 5 (0x5), region = 67 }
 0x119   :  { %287 = vsyncpa [#allocation3], 1 }
 0x11a   :  { %289 = vsyncpa [#allocation3 + $0x1], 1 }

</bundles_post_ra>
